<compile_context>
chip_gen: v5e
topology: v5e:2x2
jax: 0.10.0
libtpu: 0.0.40
codegen_flags: <defaults>
</compile_context>

<pallas_src>
import functools

import jax
import jax.numpy as jnp
from jax.experimental import pallas as pl
from jax.experimental.pallas import tpu as pltpu


def _attn_net_kernel(x_ref, w1_ref, b1_ref, w2_ref, b2_ref, at_ref, *, mxu_dtype):
    # x_ref : (TILE_N, L)               w1_ref: (L, D)  (mxu dtype or f32)
    # b1_ref: (1, D) f32                w2_ref: (D, C)  f32
    # b2_ref: (1, C) f32                at_ref: (C, TILE_N)
    x = x_ref[...]
    w1 = w1_ref[...]
    if mxu_dtype is not None:
        # Cast AFTER the DMA: HBM traffic is unchanged, but the first matmul
        # becomes a single bf16 MXU pass (vs ~3x passes for f32) with f32
        # accumulation via preferred_element_type.
        x = x.astype(mxu_dtype)
        w1 = w1.astype(mxu_dtype)
    h = jnp.dot(x, w1, preferred_element_type=jnp.float32) + b1_ref[...]
    h = jnp.tanh(h)  # VPU/EUP work, hidden under the x DMA
    # Second linear with h as a plain LHS -> (TILE_N, C).  Only this tiny
    # result goes through an XLU transpose (D-times fewer elements than
    # relayouting h), keeping the lane-dense (C, TILE_N) output store.
    a = jnp.dot(h, w2_ref[...], preferred_element_type=jnp.float32) + b2_ref[...]
    at_ref[...] = jnp.transpose(a).astype(at_ref.dtype)
    # TODO(synk): optional nn.Dropout(0.25) between tanh and the second linear
    # (constructor flag, off by default / eval mode) is not implemented.


def attn_net_forward(x, w1, b1, w2, b2, *, tile_n=4096, mxu_dtype=jnp.bfloat16):
    """Fused Attn_Net forward. Returns (A, x) like the PyTorch module.

    x : (N, L); w1 : (L, D); b1 : (D,); w2 : (D, C); b2 : (C,).
    Weights use the (in, out) layout (transposed vs. torch.nn.Linear.weight),
    so `x @ w1 + b1` is exactly PyTorch's `x @ W1.T + b1`.

    mxu_dtype: dtype for the MXU operands of the first matmul, cast in-kernel
    after the HBM DMA (accumulation stays f32).  None => pure f32 math.
    """
    N, L = x.shape
    D = w1.shape[1]
    C = w2.shape[1]
    assert w1.shape == (L, D) and b1.shape == (D,)
    assert w2.shape == (D, C) and b2.shape == (C,)
    out_dtype = x.dtype

    # One-time wrapper-side prep on tiny arrays only; x is left untouched so
    # the streamed HBM traffic stays at its native element size.
    w1_k = w1 if mxu_dtype is None else w1.astype(mxu_dtype)
    b1_2d = b1.reshape(1, D).astype(jnp.float32)
    w2_2d = w2.astype(jnp.float32)                  # (D, C), plain RHS
    b2_2d = b2.reshape(1, C).astype(jnp.float32)

    # ---- generation-aware VMEM budget -------------------------------------
    try:
        vmem_cap = int(pltpu.get_tpu_info().vmem_capacity_bytes)
    except Exception:
        vmem_cap = 64 * 2**20                       # conservative (v7x-sized)
    vmem_budget = max(32 * 2**20, min(vmem_cap * 3 // 4, 96 * 2**20))

    x_isz = jnp.dtype(x.dtype).itemsize
    w1_isz = jnp.dtype(w1_k.dtype).itemsize
    out_isz = jnp.dtype(out_dtype).itemsize
    mxu_isz = 0 if mxu_dtype is None else jnp.dtype(mxu_dtype).itemsize

    def footprint(tn):
        fp = 2 * tn * L * x_isz                               # double-buffered x tiles
        fp += 2 * max(C, 8) * tn * out_isz                    # double-buffered out tiles
        fp += 2 * (L * D * w1_isz + (D + D * C + C) * 4)      # resident weights/biases
        fp += tn * D * 4                                      # f32 h
        fp += tn * max(C, 8) * 4                              # f32 a (pre-transpose)
        fp += tn * L * mxu_isz                                # in-kernel bf16 copy of x
        fp += 2 * 2**20                                       # slop (acc / relayouts)
        return fp

    # ---- tile selection ----------------------------------------------------
    if N <= 128:
        tn = N                                                # single tile; nothing to split
    else:
        tn = max(128, (min(tile_n, N) // 128) * 128)
        # Keep >= 4 (or >= 2) grid steps so the "parallel" axis can shard across
        # v7x's two TensorCores with balanced load; neutral on 1-TC chips.
        min_steps = 4 if N >= 4 * 128 else 2
        tn = min(tn, max(128, (N // min_steps // 128) * 128))
        # Shrink until the working set fits the per-generation VMEM budget
        # (protects v7x's 64 MiB from tiles that would fit v5e/v6e's 128 MiB).
        while tn > 128 and footprint(tn) > vmem_budget:
            tn -= 128
    grid_n = pl.cdiv(N, tn)

    kernel = functools.partial(_attn_net_kernel, mxu_dtype=mxu_dtype)

    # TODO(synk): if a trace shows exposed x DMA at tile boundaries, raise the
    # x BlockSpec to pipeline_mode=pl.Buffered(3) and single-buffer the
    # resident weight specs, folding the extra tile into the VMEM budget.
    a_t = pl.pallas_call(
        kernel,
        out_shape=jax.ShapeDtypeStruct((C, N), out_dtype),
        grid_spec=pltpu.PrefetchScalarGridSpec(
            num_scalar_prefetch=0,
            grid=(grid_n,),
            in_specs=[
                pl.BlockSpec((tn, L), lambda i: (i, 0)),      # streamed x tiles
                pl.BlockSpec((L, D), lambda i: (0, 0)),       # resident weights/biases
                pl.BlockSpec((1, D), lambda i: (0, 0)),
                pl.BlockSpec((D, C), lambda i: (0, 0)),
                pl.BlockSpec((1, C), lambda i: (0, 0)),
            ],
            out_specs=pl.BlockSpec((C, tn), lambda i: (0, i)),  # lane-dense output
        ),
        compiler_params=pltpu.CompilerParams(
            dimension_semantics=("parallel",),                # rows independent
            vmem_limit_bytes=int(vmem_budget),
        ),
    )(x, w1_k, b1_2d, w2_2d, b2_2d)

    a = jnp.transpose(a_t)   # (C, N) -> (N, C); tiny
    # TODO(synk): downstream CLAM pooling (softmax over N, then A^T @ x) could be
    # fused as an accumulator over this N grid axis to avoid a second full HBM
    # pass over x; out of scope since this module's forward returns (A, x).
    return a, x


def init_attn_net_params(key, L, D, n_classes, dtype=jnp.float32):
    """Deterministic init mimicking PyTorch nn.Linear (uniform +/- 1/sqrt(fan_in))."""
    k1, k2, k3, k4 = jax.random.split(key, 4)
    bound1 = 1.0 / jnp.sqrt(L)
    bound2 = 1.0 / jnp.sqrt(D)
    w1 = jax.random.uniform(k1, (L, D), dtype, -bound1, bound1)
    b1 = jax.random.uniform(k2, (D,), dtype, -bound1, bound1)
    w2 = jax.random.uniform(k3, (D, n_classes), dtype, -bound2, bound2)
    b2 = jax.random.uniform(k4, (n_classes,), dtype, -bound2, bound2)
    return w1, b1, w2, b2


if __name__ == "__main__":
    # Small shapes consistent with the module (defaults L=1024, D=256, C=1,
    # scaled down): N instances in the bag, L features, D hidden, C classes.
    # N=512 gives a 4-step streamed grid, exercising resident weights and the
    # megacore-friendly tiling path.
    N, L, D, C = 512, 256, 64, 1

    key = jax.random.PRNGKey(0)
    kx, kp = jax.random.split(key)
    x = jax.random.normal(kx, (N, L), jnp.float32)
    w1, b1, w2, b2 = init_attn_net_params(kp, L, D, C)

    # Plain-JAX reference (same math as the PyTorch module), high precision.
    h_ref = jnp.tanh(jnp.dot(x, w1, precision="highest") + b1)
    a_ref = jnp.dot(h_ref, w2, precision="highest") + b2

    # Exact f32 MXU path.
    a_f32, x_out = attn_net_forward(x, w1, b1, w2, b2, mxu_dtype=None)
    jax.block_until_ready((a_f32, x_out))
    assert a_f32.shape == (N, C)
    assert x_out.shape == (N, L)
    assert jnp.array_equal(x_out, x)
    assert jnp.allclose(a_f32, a_ref, atol=1e-4, rtol=1e-4)

    # Default path: bf16 MXU operands (cast in-kernel, f32 accumulation);
    # HBM traffic identical to the f32 path, MXU work ~3x cheaper.
    a_bf16, _ = attn_net_forward(x, w1, b1, w2, b2)
    jax.block_until_ready(a_bf16)
    assert a_bf16.shape == (N, C)
    assert jnp.allclose(a_bf16, a_ref, atol=5e-2, rtol=5e-2)

    print("KERNEL_OK")
</pallas_src>

<mosaic_0001>
module attributes {stable_mosaic.version = 11 : i64} {
  func.func @_attn_net_kernel(%arg0: i32, %arg1: memref<128x256xf32, #tpu.memory_space<vmem>>, %arg2: memref<256x64xf32, #tpu.memory_space<vmem>>, %arg3: memref<1x64xf32, #tpu.memory_space<vmem>>, %arg4: memref<64x1xf32, #tpu.memory_space<vmem>>, %arg5: memref<1x1xf32, #tpu.memory_space<vmem>>, %arg6: memref<1x128xf32, #tpu.memory_space<vmem>>) attributes {dimension_semantics = [#tpu.dimension_semantics<parallel>], iteration_bounds = array<i64: 4>, scalar_prefetch = 0 : i64, scratch_operands = 0 : i64, tpu.core_type = #tpu.core_type<tc>, window_params = [{transform_indices = @transform_0, window_bounds = array<i64: 128, 256>}, {pipeline_mode = #tpu.pipeline_mode<synchronous>, transform_indices = @transform_1, window_bounds = array<i64: 256, 64>}, {pipeline_mode = #tpu.pipeline_mode<synchronous>, transform_indices = @transform_2, window_bounds = array<i64: 1, 64>}, {pipeline_mode = #tpu.pipeline_mode<synchronous>, transform_indices = @transform_3, window_bounds = array<i64: 64, 1>}, {pipeline_mode = #tpu.pipeline_mode<synchronous>, transform_indices = @transform_4, window_bounds = array<i64: 1, 1>}, {transform_indices = @transform_5, window_bounds = array<i64: 1, 128>}]} {
    %c0 = arith.constant 0 : index
    %c0_0 = arith.constant 0 : index
    %0 = vector.load %arg1[%c0, %c0_0] : memref<128x256xf32, #tpu.memory_space<vmem>>, vector<128x256xf32>
    %c0_1 = arith.constant 0 : index
    %c0_2 = arith.constant 0 : index
    %1 = vector.load %arg2[%c0_1, %c0_2] : memref<256x64xf32, #tpu.memory_space<vmem>>, vector<256x64xf32>
    %cst = arith.constant dense<0.000000e+00> : vector<128x64xf32>
    %2 = tpu.matmul %0, %1, %cst {dimension_numbers = #tpu.dot_dimension_numbers<[1], [0], [0], [1], [0, 0, 1, 1], [], []>} : vector<128x256xf32>, vector<256x64xf32>, vector<128x64xf32> -> vector<128x64xf32>
    %c0_3 = arith.constant 0 : index
    %c0_4 = arith.constant 0 : index
    %3 = vector.load %arg3[%c0_3, %c0_4] : memref<1x64xf32, #tpu.memory_space<vmem>>, vector<1x64xf32>
    %4 = vector.broadcast %3 : vector<1x64xf32> to vector<128x64xf32>
    %5 = arith.addf %2, %4 : vector<128x64xf32>
    %6 = math.tanh %5 : vector<128x64xf32>
    %c0_5 = arith.constant 0 : index
    %c0_6 = arith.constant 0 : index
    %7 = vector.load %arg4[%c0_5, %c0_6] : memref<64x1xf32, #tpu.memory_space<vmem>>, vector<64x1xf32>
    %cst_7 = arith.constant dense<0.000000e+00> : vector<128x1xf32>
    %8 = tpu.matmul %6, %7, %cst_7 {dimension_numbers = #tpu.dot_dimension_numbers<[1], [0], [0], [1], [0, 0, 1, 1], [], []>} : vector<128x64xf32>, vector<64x1xf32>, vector<128x1xf32> -> vector<128x1xf32>
    %c0_8 = arith.constant 0 : index
    %c0_9 = arith.constant 0 : index
    %9 = vector.load %arg5[%c0_8, %c0_9] : memref<1x1xf32, #tpu.memory_space<vmem>>, vector<1x1xf32>
    %10 = vector.broadcast %9 : vector<1x1xf32> to vector<128x1xf32>
    %11 = arith.addf %8, %10 : vector<128x1xf32>
    %12 = tpu.transpose %11, [1, 0] : vector<128x1xf32> -> vector<1x128xf32>
    %c0_10 = arith.constant 0 : index
    %c0_11 = arith.constant 0 : index
    %13 = vector.load %arg6[%c0_10, %c0_11] : memref<1x128xf32, #tpu.memory_space<vmem>>, vector<1x128xf32>
    tpu.vector_store %arg6[%c0_10, %c0_11], %12 {strides = array<i32>} : memref<1x128xf32, #tpu.memory_space<vmem>>, vector<1x128xf32>,
    return
  }
  func.func @transform_0(%arg0: i32) -> (i32, i32) {
    %c0_i32 = arith.constant 0 : i32
    %c0_i32_0 = arith.constant 0 : i32
    return %arg0, %c0_i32 : i32, i32
  }
  func.func @transform_1(%arg0: i32) -> (i32, i32) {
    %c0_i32 = arith.constant 0 : i32
    %c0_i32_0 = arith.constant 0 : i32
    %c0_i32_1 = arith.constant 0 : i32
    return %c0_i32, %c0_i32_0 : i32, i32
  }
  func.func @transform_2(%arg0: i32) -> (i32, i32) {
    %c0_i32 = arith.constant 0 : i32
    %c0_i32_0 = arith.constant 0 : i32
    %c0_i32_1 = arith.constant 0 : i32
    return %c0_i32, %c0_i32_0 : i32, i32
  }
  func.func @transform_3(%arg0: i32) -> (i32, i32) {
    %c0_i32 = arith.constant 0 : i32
    %c0_i32_0 = arith.constant 0 : i32
    %c0_i32_1 = arith.constant 0 : i32
    return %c0_i32, %c0_i32_0 : i32, i32
  }
  func.func @transform_4(%arg0: i32) -> (i32, i32) {
    %c0_i32 = arith.constant 0 : i32
    %c0_i32_0 = arith.constant 0 : i32
    %c0_i32_1 = arith.constant 0 : i32
    return %c0_i32, %c0_i32_0 : i32, i32
  }
  func.func @transform_5(%arg0: i32) -> (i32, i32) {
    %c0_i32 = arith.constant 0 : i32
    %c0_i32_0 = arith.constant 0 : i32
    return %c0_i32, %arg0 : i32, i32
  }
}

</mosaic_0001>

<bundles_post_ra>
// kernel: tpu_custom_call.1
= control target key start
LH: loop header
LB: loop body
LE: loop exit
PB: predicated region body
PF: predicated region fallthrough
CT: control target
= control target key end

     0   :  { %s1347_s0 = inlined_call_operand.hbm [shape: f32[512,256], index: 0, kind: input, shape index: {}]   ;;  %s1348_s1 = inlined_call_operand.vmem [shape: f32[256,64], index: 1, kind: input, shape index: {}]   ;;  %s1349_s2 = inlined_call_operand.vmem [shape: f32[1,64], index: 2, kind: input, shape index: {}]   ;;  %s1350_s3 = inlined_call_operand.vmem [shape: f32[64,1], index: 3, kind: input, shape index: {}]   ;;  %s1351_s4 = inlined_call_operand.<no memory space> [shape: f32[1,1], index: 4, kind: input, shape index: {}]   ;;  %s1352_s5 = inlined_call_operand.hbm [shape: f32[1,512], index: 5, kind: output, shape index: {}]  }
   0x1   :  { %v10_v0 = vstv %s1351_s4 }
   0x2   :  { %11 = vst [vmem:[#allocation2] sm:$0x1] %v10_v0 }
   0x3   :  { %12 = vsyncpa [#allocation4], 0 }
   0x4   :  { %14 = vsyncpa [#allocation4 + $0x1], 0 }
   0x5   :  { %15 = vsyncpa [#allocation5], 0 }
   0x6   :  { %17 = vsyncpa [#allocation5 + $0x1], 0  ;;  %s984_s20 = smov 0   ;;  %s986_s21 = smov 0  }
   0x7   :  { %s988_s22 = smov 0   ;;  %s990_s23 = smov 0  }
   0x8 LB: > { %s1005_s4 = sadd.s32 4294967295, %s947_s23   ;;  %s700_s24 = sadd.s32 4294967294, %s947_s23   ;;  %s947_s23 = sphi %s990_s23, %s1361_s23   ;;  %s943_s22 = sphi %s988_s22, %s1360_s22   ;;  %s939_s21 = sphi %s986_s21, %s1359_s21   ;;  %s935_s20 = sphi %s984_s20, %s1358_s20  }
   0x9   : > { %s1009_s25 = sadd.s32 1, %s947_s23   ;;  %s30_s26 = sadd.s32 1, %s943_s22 }
   0xa   : > { %s27_s27 = ssub.s32 %s947_s23, %s1009_s25  ;;  %p37_p0 = scmp.ne.s32.totalorder %s943_s22, %s939_s21 }
   0xb   : > { %p28_p1 = scmp.eq.s32.totalorder %s27_s27, 0  ;;  %p38_p2 = scmp.eq.s32.totalorder %s947_s23, 0 }
   0xc   : > { %p43_p3 = scmp.ne.s32.totalorder %s939_s21, %s935_s20  ;;  %p44_p4 = scmp.eq.s32.totalorder %s1005_s4, 0 }
   0xd   : > { %s1021_s28 = scalar_select %p28_p1, %s943_s22, %s30_s26  }
   0xe   : > { %p1023_p5 = por %p38_p2, %p37_p0  ;;  %p1027_p6 = por %p44_p4, %p43_p3 }
   0xf   : > { %p151_p7 = scmp.eq.s32.totalorder %s1005_s4, 3  ;;  %p157_p8 = scmp.eq.s32.totalorder %s700_s24, 3 }
  0x10   : > { %p781_p9 = scmp.lt.s32.totalorder %s947_s23, 4  ;;  %s189_s8 = sand.u32 1, %s943_s22  }
  0x11   : > { %p1033_p10 = por %p151_p7, %p37_p0  ;;  %p1037_p11 = por %p157_p8, %p43_p3 }
  0x12   : > { %s728_s9 = sshll.u32 %s947_s23, 8  ;;  %s703_s10 = sshll.u32 %s189_s8, 8 }
  0x13   : > { %s199_s13 = scalar_lea.hbm %s1347_s0, %s728_s9  ;;  %s193_s15 = scalar_lea.vmem [#allocation3], %s703_s10 }
  0x14   : > { %s200_s14 = sshll.u32 %s199_s13, 4  ;;  %s202_s16 = sshll.u32 %s193_s15, 4  ;;  %s201_s14 = int_to_ptr.hbm [resolvable:$true] %s200_s14  ;;  %s203_s16 = int_to_ptr.vmem [resolvable:$true] %s202_s16 }
  0x15   : > { %p1048_p12 = pnand %p781_p9, %p1023_p5  ;;  %p707_p13 = scmp.ge.s32.totalorder %s947_s23, 1 }
  0x16   : > { %p210_p0 = scmp.lt.s32.totalorder %s947_s23, 5  ;;  %s190_s18 = scalar_lea.sflag [#allocation4], %s189_s8 }
  0x17   : > { %s851_s19 = sshra.s32 %s201_s14, 4  ;;  %p855_p2 = pneg %p1048_p12  ;;  %s852_s19 = int_to_ptr.hbm [resolvable:$true] %s851_s19 }
  0x18   : > { %s853_s24 = scalar_lea.hbm %s852_s19, 256  ;;  %s858_s29 = scalar_lea.hbm %s1347_s0, 1024 }
  0x19   : > { %p854_p1 = scmp.ne.s32.totalorder %s852_s19, %s853_s24  ;;  %p859_p5 = scmp.lt.s32.totalorder %s852_s19, %s1347_s0 }
  0x1a   : > { %p860_p7 = scmp.lt.s32.totalorder %s858_s29, %s853_s24 }
  0x1b   : > { %p856_p3 = pnand %p855_p2, %p854_p1 }
  0x1c   : > { %p861_p8 = por %p860_p7, %p859_p5 }
  0x1d   : > { %p857_p4 = pneg %p856_p3 }
  0x1f   : > { %p862_p9 = pnand %p861_p8, %p857_p4 }
  0x21   : > { %865 = shalt.err (!%p862_p9)
}
  0x22   : > { %s949_s8 = smov 256   ;;  %s950_s11 = smov 16  }
  0x23   : > { %776 = dma.hbm_to_vmem [thread:$0]  (!%p1048_p12), %s201_s14, 4096, %s203_s16, %s190_s18, %s949_s8, %s949_s8, %s950_s11  }
  0x24   : > { %p211_p1 = pnand %p707_p13, %p210_p0 }
  0x25   : > { %s1069_s12 = sand.u32 (!%p211_p1), 1, %s939_s21  }
  0x26   : > { %214 = sbr.rel (%p211_p1) target bundleno = 515 (0x203), region = 40  ;;  %s708_s13 = sshll.u32 (!%p211_p1), %s1069_s12, 8 }
  0x27   : > { %s217_s15 = scalar_lea.sflag (!%p211_p1), [#allocation4], %s1069_s12  ;;  %s1073_s19 = scalar_lea.vmem (!%p211_p1), [#allocation3], %s708_s13 }
  0x2b   : > { %926 = dma.done.wait (%p1027_p6), %s217_s15, 4096  }
  0x2c   : > { %928 = vsyncadd (%p1027_p6), %s217_s15, 4294963200  ;;  %v295_v1 = vld [vmem:[%s1348_s1 + $0x78] sm:$0xff]  ;;  %v294_v2 = vld [vmem:[%s1348_s1 + $0x70] sm:$0xff]  ;;  %vm474_vm0 = vcmask 523264   ;;  %s630_s30 = scalar_lea.hbm %s1352_s5, %s1005_s4  ;;  %s246_s9 = scalar_lea.vmem [#allocation6], %s1069_s12 }
  0x2d   : > { %v1088_v3 = vld [vmem:[%s1348_s1 + $0xf8] sm:$0xff]  ;;  %316 = vmatpush.msra.mxu0 %v295_v1  ;;  %v1094_v4 = vld [vmem:[%s1348_s1 + $0xf0] sm:$0xff]  ;;  %v293_v5 = vld [vmem:[%s1348_s1 + $0x68] sm:$0xff]  ;;  %729 = vmatpush.msra.mxu3 %v295_v1  ;;  %s632_s10 = sshll.u32 %s246_s9, 4  ;;  %s634_s8 = sshll.u32 %s630_s30, 4  ;;  %s633_s10 = int_to_ptr.vmem [resolvable:$true] %s632_s10  ;;  %s635_s8 = int_to_ptr.hbm [resolvable:$true] %s634_s8 }
  0x2e   : > { %381 = vmatpush.msra.mxu1 %v1088_v3  ;;  %v1102_v6 = vld [vmem:[%s1348_s1 + $0xe8] sm:$0xff]  ;;  %v292_v7 = vld [vmem:[%s1348_s1 + $0x60] sm:$0xff]  ;;  %v291_v9 = vld [vmem:[%s1348_s1 + $0x58] sm:$0xff]  ;;  %s622_s11 = scalar_lea.sflag [#allocation5], %s1069_s12  ;;  %s895_s13 = sshra.s32 %s635_s8, 4  ;;  %s896_s13 = int_to_ptr.hbm [resolvable:$true] %s895_s13 }
  0x2f   : > { %317 = vmatpush.msra.mxu0 %v294_v2  ;;  %v1111_v8 = vld [vmem:[%s1348_s1 + $0xe0] sm:$0xff]  ;;  %730 = vmatpush.msra.mxu3 %v294_v2  ;;  %v1120_v10 = vld [vmem:[%s1348_s1 + $0xd8] sm:$0xff]  ;;  %v290_v11 = vld [vmem:[%s1348_s1 + $0x50] sm:$0xff]  ;;  %s901_s16 = scalar_lea.hbm %s1352_s5, 4  ;;  %p902_p0 = scmp.lt.s32.totalorder %s896_s13, %s1352_s5 }
  0x30   : > { %382 = vmatpush.msra.mxu1 %v1094_v4  ;;  %v1129_v12 = vld [vmem:[%s1348_s1 + $0xd0] sm:$0xff]  ;;  %v289_v13 = vld [vmem:[%s1348_s1 + $0x48] sm:$0xff]  ;;  %v288_v15 = vld [vmem:[%s1348_s1 + $0x40] sm:$0xff] }
  0x31   : > { %318 = vmatpush.msra.mxu0 %v293_v5  ;;  %731 = vmatpush.msra.mxu3 %v293_v5  ;;  %v1138_v14 = vld [vmem:[%s1348_s1 + $0xc8] sm:$0xff]  ;;  %v1147_v16 = vld [vmem:[%s1348_s1 + $0xc0] sm:$0xff]  ;;  %v287_v17 = vld [vmem:[%s1348_s1 + $0x38] sm:$0xff] }
  0x32   : > { %383 = vmatpush.msra.mxu1 %v1102_v6  ;;  %v1156_v18 = vld [vmem:[%s1348_s1 + $0xb8] sm:$0xff]  ;;  %v286_v19 = vld [vmem:[%s1348_s1 + $0x30] sm:$0xff]  ;;  %v285_v21 = vld [vmem:[%s1348_s1 + $0x28] sm:$0xff] }
  0x33   : > { %319 = vmatpush.msra.mxu0 %v292_v7  ;;  %732 = vmatpush.msra.mxu3 %v292_v7  ;;  %v1165_v20 = vld [vmem:[%s1348_s1 + $0xb0] sm:$0xff]  ;;  %v301_v22 = vld [vmem:[%s1348_s1 + $0xa8] sm:$0xff]  ;;  %v284_v23 = vld [vmem:[%s1348_s1 + $0x20] sm:$0xff] }
  0x34   : > { %384 = vmatpush.msra.mxu1 %v1111_v8  ;;  %v300_v24 = vld [vmem:[%s1348_s1 + $0xa0] sm:$0xff]  ;;  %v283_v25 = vld [vmem:[%s1348_s1 + $0x18] sm:$0xff]  ;;  %v282_v27 = vld [vmem:[%s1348_s1 + $0x10] sm:$0xff] }
  0x35   : > { %320 = vmatpush.msra.mxu0 %v291_v9  ;;  %733 = vmatpush.msra.mxu3 %v291_v9  ;;  %v299_v26 = vld [vmem:[%s1348_s1 + $0x98] sm:$0xff]  ;;  %v298_v28 = vld [vmem:[%s1348_s1 + $0x90] sm:$0xff]  ;;  %v281_v29 = vld [vmem:[%s1348_s1 + $0x8] sm:$0xff] }
  0x36   : > { %385 = vmatpush.msra.mxu1 %v1120_v10  ;;  %v297_v30 = vld [vmem:[%s1348_s1 + $0x88] sm:$0xff]  ;;  %v280_v31 = vld [vmem:[%s1348_s1] sm:$0xff]  ;;  %v250_v36 = vld [vmem:[%s1073_s19 + $0x10] sm:$0xff] }
  0x37   : > { %321 = vmatpush.msra.mxu0 %v290_v11  ;;  %734 = vmatpush.msra.mxu3 %v290_v11  ;;  %v296_v32 = vld [vmem:[%s1348_s1 + $0x80] sm:$0xff]  ;;  %v249_v34 = vld [vmem:[%s1073_s19 + $0x8] sm:$0xff]  ;;  %v274_v38 = vld [vmem:[%s1073_s19 + $0xd0] sm:$0xff] }
  0x38   : > { %386 = vmatpush.msra.mxu1 %v1129_v12  ;;  %v248_v33 = vld [vmem:[%s1073_s19] sm:$0xff]  ;;  %v251_v37 = vld [vmem:[%s1073_s19 + $0x18] sm:$0xff]  ;;  %v253_v40 = vld [vmem:[%s1073_s19 + $0x28] sm:$0xff] }
  0x39   : > { %322 = vmatpush.msra.mxu0 %v289_v13  ;;  %735 = vmatpush.msra.mxu3 %v289_v13  ;;  %v272_v35 = vld [vmem:[%s1073_s19 + $0xc0] sm:$0xff]  ;;  %v254_v42 = vld [vmem:[%s1073_s19 + $0x30] sm:$0xff]  ;;  %v255_v43 = vld [vmem:[%s1073_s19 + $0x38] sm:$0xff] }
  0x3a   : > { %387 = vmatpush.msra.mxu1 %v1138_v14  ;;  %v252_v39 = vld [vmem:[%s1073_s19 + $0x20] sm:$0xff]  ;;  %v278_v44 = vld [vmem:[%s1073_s19 + $0xf0] sm:$0xff]  ;;  %v257_v46 = vld [vmem:[%s1073_s19 + $0x48] sm:$0xff] }
  0x3b   : > { %323 = vmatpush.msra.mxu0 %v288_v15  ;;  %736 = vmatpush.msra.mxu3 %v288_v15  ;;  %v276_v41 = vld [vmem:[%s1073_s19 + $0xe0] sm:$0xff]  ;;  %v273_v47 = vld [vmem:[%s1073_s19 + $0xc8] sm:$0xff]  ;;  %v258_v48 = vld [vmem:[%s1073_s19 + $0x50] sm:$0xff] }
  0x3c   : > { %388 = vmatpush.msra.mxu1 %v1147_v16  ;;  %v256_v45 = vld [vmem:[%s1073_s19 + $0x40] sm:$0xff]  ;;  %v259_v49 = vld [vmem:[%s1073_s19 + $0x58] sm:$0xff]  ;;  %v261_v52 = vld [vmem:[%s1073_s19 + $0x68] sm:$0xff] }
  0x3d   : > { %324 = vmatpush.msra.mxu0 %v287_v17  ;;  %737 = vmatpush.msra.mxu3 %v287_v17  ;;  %v275_v50 = vld [vmem:[%s1073_s19 + $0xd8] sm:$0xff]  ;;  %v260_v51 = vld [vmem:[%s1073_s19 + $0x60] sm:$0xff]  ;;  %v277_v53 = vld [vmem:[%s1073_s19 + $0xe8] sm:$0xff] }
  0x3e   : > { %389 = vmatpush.msra.mxu1 %v1156_v18  ;;  %v262_v54 = vld [vmem:[%s1073_s19 + $0x70] sm:$0xff]  ;;  %v263_v55 = vld [vmem:[%s1073_s19 + $0x78] sm:$0xff]  ;;  %v264_v59 = vld [vmem:[%s1073_s19 + $0x80] sm:$0xff] }
  0x3f   : > { %325 = vmatpush.msra.mxu0 %v286_v19  ;;  %738 = vmatpush.msra.mxu3 %v286_v19  ;;  %v279_v56 = vld [vmem:[%s1073_s19 + $0xf8] sm:$0xff]  ;;  %v468_v58 = vld [vmem:[%s1350_s3 + $0x30] sm:$0xff]  ;;  %v268_v63 = vld [vmem:[%s1073_s19 + $0xa0] sm:$0xff] }
  0x40   : > { %390 = vmatpush.msra.mxu1 %v1165_v20  ;;  %v469_v57 = vld [vmem:[%s1350_s3 + $0x38] sm:$0xff]  ;;  %v265_v60 = vld [vmem:[%s1073_s19 + $0x88] sm:$0xff]  ;;  %v1274_v9 = vld [vmem:[%s1349_s2] ss:$0 sm:$0xff] }
  0x41   : > { %326 = vmatpush.msra.mxu0 %v285_v21  ;;  %739 = vmatpush.msra.mxu3 %v285_v21  ;;  %v266_v61 = vld [vmem:[%s1073_s19 + $0x90] sm:$0xff]  ;;  %v267_v62 = vld [vmem:[%s1073_s19 + $0x98] sm:$0xff]  ;;  %v269_v0 = vld [vmem:[%s1073_s19 + $0xa8] sm:$0xff] }
  0x42   : > { %391 = vmatpush.msra.mxu1 %v301_v22  ;;  %531 = vmatpush.msra.mxu2 %v469_v57  ;;  %v270_v1 = vld [vmem:[%s1073_s19 + $0xb0] sm:$0xff]  ;;  %v271_v2 = vld [vmem:[%s1073_s19 + $0xb8] sm:$0xff]  ;;  %v463_v7 = vld [vmem:[%s1350_s3 + $0x8] sm:$0xff]  ;;  %s897_s19 = scalar_lea.hbm %s896_s13, 1 }
  0x43   : > { %327 = vmatpush.msra.mxu0 %v284_v23  ;;  %740 = vmatpush.msra.mxu3 %v284_v23  ;;  %v465_v5 = vld [vmem:[%s1350_s3 + $0x18] sm:$0xff]  ;;  %p898_p6 = scmp.ne.s32.totalorder %s896_s13, %s897_s19  ;;  %p903_p2 = scmp.lt.s32.totalorder %s901_s16, %s897_s19 }
  0x44   : > { %392 = vmatpush.msra.mxu1 %v300_v24  ;;  %532 = vmatpush.msra.mxu2 %v468_v58 }
  0x45   : > { %328 = vmatpush.msra.mxu0 %v283_v25  ;;  %741 = vmatpush.msra.mxu3 %v283_v25  ;;  %p899_p12 = pnand %p898_p6, %p1033_p10  ;;  %p904_p3 = por %p903_p2, %p902_p0 }
  0x46   : > { %393 = vmatpush.msra.mxu1 %v299_v26 }
  0x47   : > { %329 = vmatpush.msra.mxu0 %v282_v27  ;;  %742 = vmatpush.msra.mxu3 %v282_v27  ;;  %p900_p13 = pneg %p899_p12 }
  0x48   : > { %394 = vmatpush.msra.mxu1 %v298_v28 }
  0x49   : > { %330 = vmatpush.msra.mxu0 %v281_v29  ;;  %743 = vmatpush.msra.mxu3 %v281_v29  ;;  %p905_p4 = pnand %p904_p3, %p900_p13 }
  0x4a   : > { %395 = vmatpush.msra.mxu1 %v297_v30 }
  0x4b   : > { %331 = vmatpush.msra.mxu0 %v280_v31  ;;  %744 = vmatpush.msra.mxu3 %v280_v31 }
  0x4c   : > { %396 = vmatpush.msra.mxu1 %v296_v32  ;;  %332 = vmatmul.f32.vlgmr.msra.gmra.mxu0 %v248_v33 }
  0x4d   : > { %397 = vmatmul.f32.vlgmr.msra.gmra.mxu1 %v249_v34  ;;  %368 = vmatmul.f32.vlgmr.msra.gmra.mxu3 %v272_v35 }
  0x4e   : > { %745 = vmatpush.msrb.mxu3 %v1088_v3  ;;  %v467_v3 = vld [vmem:[%s1350_s3 + $0x28] sm:$0xff] }
  0x4f   : > { %533 = vmatpush.msra.mxu2 %v467_v3 }
  0x50   : > { %746 = vmatpush.msrb.mxu3 %v1094_v4  ;;  %v466_v4 = vld [vmem:[%s1350_s3 + $0x20] sm:$0xff] }
  0x51   : > { %534 = vmatpush.msra.mxu2 %v466_v4 }
  0x52   : > { %747 = vmatpush.msrb.mxu3 %v1102_v6  ;;  %v464_v6 = vld [vmem:[%s1350_s3 + $0x10] sm:$0xff] }
  0x53   : > { %535 = vmatpush.msra.mxu2 %v465_v5 }
  0x54   : > { %335 = vmatmul.f32.gmra.mxu0 %v250_v36  ;;  %748 = vmatpush.msrb.mxu3 %v1111_v8  ;;  %v462_v8 = vld [vmem:[%s1350_s3] sm:$0xff] }
  0x55   : > { %400 = vmatmul.f32.gmra.mxu1 %v251_v37  ;;  %371 = vmatmul.f32.gmra.mxu3 %v274_v38 }
  0x56   : > { %749 = vmatpush.msrb.mxu3 %v1120_v10  ;;  %536 = vmatpush.msra.mxu2 %v464_v6 }
  0x58   : > { %750 = vmatpush.msrb.mxu3 %v1129_v12  ;;  %537 = vmatpush.msra.mxu2 %v463_v7 }
  0x5a   : > { %751 = vmatpush.msrb.mxu3 %v1138_v14  ;;  %538 = vmatpush.msra.mxu2 %v462_v8 }
  0x5c   : > { %338 = vmatmul.f32.gmra.mxu0 %v252_v39  ;;  %752 = vmatpush.msrb.mxu3 %v1147_v16 }
  0x5d   : > { %403 = vmatmul.f32.gmra.mxu1 %v253_v40  ;;  %374 = vmatmul.f32.gmra.mxu3 %v276_v41 }
  0x5e   : > { %753 = vmatpush.msrb.mxu3 %v1156_v18 }
  0x60   : > { %754 = vmatpush.msrb.mxu3 %v1165_v20 }
  0x62   : > { %755 = vmatpush.msrb.mxu3 %v301_v22 }
  0x64   : > { %341 = vmatmul.f32.gmra.mxu0 %v254_v42  ;;  %756 = vmatpush.msrb.mxu3 %v300_v24 }
  0x65   : > { %406 = vmatmul.f32.gmra.mxu1 %v255_v43  ;;  %377 = vmatmul.f32.gmra.mxu3 %v278_v44 }
  0x66   : > { %757 = vmatpush.msrb.mxu3 %v299_v26 }
  0x68   : > { %758 = vmatpush.msrb.mxu3 %v298_v28 }
  0x6a   : > { %759 = vmatpush.msrb.mxu3 %v297_v30 }
  0x6c   : > { %344 = vmatmul.f32.gmra.mxu0 %v256_v45  ;;  %760 = vmatpush.msrb.mxu3 %v296_v32 }
  0x6d   : > { %409 = vmatmul.f32.gmra.mxu1 %v257_v46  ;;  %433 = vmatmul.f32.vlgmr.msrb.gmra.mxu3 %v273_v47 }
  0x6e   : > { %761 = vmatpush.msra.mxu3 %v469_v57 }
  0x70   : > { %762 = vmatpush.msra.mxu3 %v468_v58 }
  0x72   : > { %763 = vmatpush.msra.mxu3 %v467_v3 }
  0x74   : > { %347 = vmatmul.f32.gmra.mxu0 %v258_v48  ;;  %764 = vmatpush.msra.mxu3 %v466_v4 }
  0x75   : > { %412 = vmatmul.f32.gmra.mxu1 %v259_v49  ;;  %436 = vmatmul.f32.gmra.mxu3 %v275_v50 }
  0x76   : > { %765 = vmatpush.msra.mxu3 %v465_v5 }
  0x78   : > { %766 = vmatpush.msra.mxu3 %v464_v6 }
  0x7a   : > { %767 = vmatpush.msra.mxu3 %v463_v7 }
  0x7c   : > { %350 = vmatmul.f32.gmra.mxu0 %v260_v51  ;;  %768 = vmatpush.msra.mxu3 %v462_v8 }
  0x7d   : > { %415 = vmatmul.f32.gmra.mxu1 %v261_v52  ;;  %439 = vmatmul.f32.gmra.mxu3 %v277_v53 }
  0x84   : > { %353 = vmatmul.f32.gmra.mxu0 %v262_v54 }
  0x85   : > { %418 = vmatmul.f32.gmra.mxu1 %v263_v55  ;;  %442 = vmatmul.f32.gmra.mxu3 %v279_v56 }
  0x8c   : > { %356 = vmatmul.f32.gmra.mxu0 %v264_v59 }
  0x8d   : > { %421 = vmatmul.f32.gmra.mxu1 %v265_v60 }
  0x94   : > { %359 = vmatmul.f32.gmra.mxu0 %v266_v61 }
  0x95   : > { %424 = vmatmul.f32.gmra.mxu1 %v267_v62 }
  0x9c   : > { %362 = vmatmul.f32.gmra.mxu0 %v268_v63 }
  0x9d   : > { %427 = vmatmul.f32.gmra.mxu1 %v269_v0 }
  0xa4   : > { %365 = vmatmul.f32.gmra.mxu0 %v270_v1 }
  0xa5   : > { %430 = vmatmul.f32.gmra.mxu1 %v271_v2 }
  0xc9   : > { %v333_v10 = vpop.f32.mrf.mxu0 }
  0xca   : > { %v398_v11 = vpop.f32.mrf.mxu1  ;;  %v334_v12 = vadd.f32 %v1274_v9, %v333_v10 }
  0xcc   : > { %v399_v13 = vadd.f32 %v398_v11, %v334_v12 }
  0xce   : > { %819 = vtanh.f32 %v399_v13 }
  0xd0   : > { %v1278_v17 = vpop.f32.mrf.mxu3 }
  0xd1   : > { %v336_v14 = vpop.f32.mrf.mxu0 }
  0xd2   : > { %v401_v15 = vpop.f32.mrf.mxu1  ;;  %v337_v16 = vadd.f32 %v1274_v9, %v336_v14 }
  0xd4   : > { %v820_v18 = vpop.eup %819  ;;  %v402_v19 = vadd.f32 %v401_v15, %v337_v16 }
  0xd5   : > { %709 = vmatmul.msk.f32.vlgmr.msra.gmra.mxu2 %vm474_vm0, %v820_v18 }
  0xd6   : > { %821 = vtanh.f32 %v402_v19 }
  0xd8   : > { %v1282_v23 = vpop.f32.mrf.mxu3 }
  0xd9   : > { %v339_v20 = vpop.f32.mrf.mxu0 }
  0xda   : > { %v404_v21 = vpop.f32.mrf.mxu1  ;;  %v340_v22 = vadd.f32 %v1274_v9, %v339_v20 }
  0xdc   : > { %v822_v24 = vpop.eup %821  ;;  %v405_v25 = vadd.f32 %v404_v21, %v340_v22  ;;  %v370_v21 = vadd.f32 %v1274_v9, %v1278_v17 }
  0xdd   : > { %710 = vmatmul.msk.f32.gmra.mxu2 %vm474_vm0, %v822_v24 }
  0xde   : > { %823 = vtanh.f32 %v405_v25  ;;  %v373_v25 = vadd.f32 %v1274_v9, %v1282_v23 }
  0xe0   : > { %v375_v29 = vpop.f32.mrf.mxu3 }
  0xe1   : > { %v342_v26 = vpop.f32.mrf.mxu0  ;;  %v376_v50 = vadd.f32 %v1274_v9, %v375_v29  ;;  %v818_v29 = vld [vmem:[#allocation2] ss:$0 sm:$0xff] }
  0xe2   : > { %v407_v27 = vpop.f32.mrf.mxu1  ;;  %v343_v28 = vadd.f32 %v1274_v9, %v342_v26 }
  0xe4   : > { %v824_v30 = vpop.eup %823  ;;  %v408_v31 = vadd.f32 %v407_v27, %v343_v28 }
  0xe5   : > { %711 = vmatmul.msk.f32.gmra.mxu2 %vm474_vm0, %v824_v30 }
  0xe6   : > { %825 = vtanh.f32 %v408_v31 }
  0xe8   : > { %v378_v35 = vpop.f32.mrf.mxu3 }
  0xe9   : > { %v345_v32 = vpop.f32.mrf.mxu0  ;;  %v379_v58 = vadd.f32 %v1274_v9, %v378_v35 }
  0xea   : > { %v410_v33 = vpop.f32.mrf.mxu1  ;;  %v346_v34 = vadd.f32 %v1274_v9, %v345_v32 }
  0xec   : > { %v826_v36 = vpop.eup %825  ;;  %v411_v37 = vadd.f32 %v410_v33, %v346_v34 }
  0xed   : > { %712 = vmatmul.msk.f32.gmra.mxu2 %vm474_vm0, %v826_v36 }
  0xee   : > { %827 = vtanh.f32 %v411_v37 }
  0xf0   : > { %v434_v41 = vpop.f32.mrf.mxu3 }
  0xf1   : > { %v348_v38 = vpop.f32.mrf.mxu0  ;;  %v435_v22 = vadd.f32 %v434_v41, %v370_v21 }
  0xf2   : > { %v413_v39 = vpop.f32.mrf.mxu1  ;;  %v349_v40 = vadd.f32 %v1274_v9, %v348_v38 }
  0xf4   : > { %v828_v42 = vpop.eup %827  ;;  %v414_v43 = vadd.f32 %v413_v39, %v349_v40 }
  0xf5   : > { %713 = vmatmul.msk.f32.gmra.mxu2 %vm474_vm0, %v828_v42 }
  0xf6   : > { %829 = vtanh.f32 %v414_v43 }
  0xf8   : > { %v437_v47 = vpop.f32.mrf.mxu3 }
  0xf9   : > { %v351_v44 = vpop.f32.mrf.mxu0  ;;  %v438_v26 = vadd.f32 %v437_v47, %v373_v25 }
  0xfa   : > { %v416_v45 = vpop.f32.mrf.mxu1  ;;  %v352_v46 = vadd.f32 %v1274_v9, %v351_v44 }
  0xfc   : > { %v830_v48 = vpop.eup %829  ;;  %v417_v49 = vadd.f32 %v416_v45, %v352_v46 }
  0xfd   : > { %714 = vmatmul.msk.f32.gmra.mxu2 %vm474_vm0, %v830_v48 }
  0xfe   : > { %831 = vtanh.f32 %v417_v49 }
 0x100   : > { %v440_v54 = vpop.f32.mrf.mxu3 }
 0x101   : > { %v354_v51 = vpop.f32.mrf.mxu0  ;;  %v441_v55 = vadd.f32 %v440_v54, %v376_v50 }
 0x102   : > { %v419_v52 = vpop.f32.mrf.mxu1  ;;  %v355_v53 = vadd.f32 %v1274_v9, %v354_v51 }
 0x103   : > { %833 = vtanh.f32 %v441_v55 }
 0x104   : > { %v832_v56 = vpop.eup %831  ;;  %v420_v57 = vadd.f32 %v419_v52, %v355_v53 }
 0x105   : > { %715 = vmatmul.msk.f32.gmra.mxu2 %vm474_vm0, %v832_v56 }
 0x106   : > { %835 = vtanh.f32 %v420_v57 }
 0x108   : > { %v443_v62 = vpop.f32.mrf.mxu3 }
 0x109   : > { %v357_v59 = vpop.f32.mrf.mxu0  ;;  %v834_v63 = vpop.eup %833  ;;  %v444_v0 = vadd.f32 %v443_v62, %v379_v58 }
 0x10a   : > { %v422_v60 = vpop.f32.mrf.mxu1  ;;  %v358_v61 = vadd.f32 %v1274_v9, %v357_v59  ;;  %723 = vmatmul.msk.f32.vlgmr.msra.gmra.mxu3 %vm474_vm0, %v834_v63 }
 0x10b   : > { %837 = vtanh.f32 %v444_v0 }
 0x10c   : > { %v836_v1 = vpop.eup %835  ;;  %v423_v2 = vadd.f32 %v422_v60, %v358_v61 }
 0x10d   : > { %716 = vmatmul.msk.f32.gmra.mxu2 %vm474_vm0, %v836_v1 }
 0x10e   : > { %839 = vtanh.f32 %v423_v2 }
 0x111   : > { %v360_v3 = vpop.f32.mrf.mxu0  ;;  %v838_v6 = vpop.eup %837 }
 0x112   : > { %v425_v4 = vpop.f32.mrf.mxu1  ;;  %v361_v5 = vadd.f32 %v1274_v9, %v360_v3  ;;  %724 = vmatmul.msk.f32.gmra.mxu3 %vm474_vm0, %v838_v6 }
 0x114   : > { %v840_v7 = vpop.eup %839  ;;  %v426_v8 = vadd.f32 %v425_v4, %v361_v5 }
 0x115   : > { %717 = vmatmul.msk.f32.gmra.mxu2 %vm474_vm0, %v840_v7 }
 0x116   : > { %841 = vtanh.f32 %v426_v8 }
 0x119   : > { %v363_v10 = vpop.f32.mrf.mxu0 }
 0x11a   : > { %v428_v11 = vpop.f32.mrf.mxu1  ;;  %v364_v12 = vadd.f32 %v1274_v9, %v363_v10 }
 0x11c   : > { %v842_v13 = vpop.eup %841  ;;  %v429_v14 = vadd.f32 %v428_v11, %v364_v12 }
 0x11d   : > { %718 = vmatmul.msk.f32.gmra.mxu2 %vm474_vm0, %v842_v13 }
 0x11e   : > { %843 = vtanh.f32 %v429_v14 }
 0x121   : > { %v366_v15 = vpop.f32.mrf.mxu0 }
 0x122   : > { %v431_v16 = vpop.f32.mrf.mxu1  ;;  %v367_v18 = vadd.f32 %v1274_v9, %v366_v15 }
 0x124   : > { %v844_v19 = vpop.eup %843  ;;  %v432_v20 = vadd.f32 %v431_v16, %v367_v18 }
 0x125   : > { %719 = vmatmul.msk.f32.gmra.mxu2 %vm474_vm0, %v844_v19 }
 0x126   : > { %845 = vtanh.f32 %v432_v20 }
 0x127   : > { %847 = vtanh.f32 %v435_v22 }
 0x128   : > { %849 = vtanh.f32 %v438_v26 }
 0x12c   : > { %v846_v24 = vpop.eup %845 }
 0x12d   : > { %720 = vmatmul.msk.f32.gmra.mxu2 %vm474_vm0, %v846_v24  ;;  %v848_v27 = vpop.eup %847 }
 0x12e   : > { %v850_v28 = vpop.eup %849 }
 0x135   : > { %721 = vmatmul.msk.f32.gmra.mxu2 %vm474_vm0, %v848_v27 }
 0x13d   : > { %722 = vmatmul.msk.f32.gmra.mxu2 %vm474_vm0, %v850_v28 }
 0x158   : > { %v540_v30 = vpop.f32.mrf.mxu2 }
 0x159   : > { %v541_v17 = vadd.f32 %v818_v29, %v540_v30 }
 0x15b   : > { %588 = vxpose.xlu0.b32.start [1/16] (narrow) %v541_v17, 8 }
 0x160   : > { %v543_v31 = vpop.f32.mrf.mxu2 }
 0x161   : > { %v544_v32 = vadd.f32 %v818_v29, %v543_v31 }
 0x163   : > { %589 = vxpose.xlu0.b32.cont [2/16] (narrow) %v544_v32, 8 }
 0x168   : > { %v546_v33 = vpop.f32.mrf.mxu2 }
 0x169   : > { %v547_v34 = vadd.f32 %v818_v29, %v546_v33 }
 0x16b   : > { %590 = vxpose.xlu0.b32.cont [3/16] (narrow) %v547_v34, 8 }
 0x170   : > { %v549_v9 = vpop.f32.mrf.mxu2 }
 0x171   : > { %v550_v23 = vadd.f32 %v818_v29, %v549_v9 }
 0x173   : > { %591 = vxpose.xlu0.b32.cont [4/16] (narrow) %v550_v23, 8 }
 0x178   : > { %v552_v35 = vpop.f32.mrf.mxu2 }
 0x179   : > { %v553_v36 = vadd.f32 %v818_v29, %v552_v35 }
 0x17b   : > { %592 = vxpose.xlu0.b32.cont [5/16] (narrow) %v553_v36, 8 }
 0x180   : > { %v555_v37 = vpop.f32.mrf.mxu2 }
 0x181   : > { %v556_v38 = vadd.f32 %v818_v29, %v555_v37 }
 0x183   : > { %593 = vxpose.xlu0.b32.cont [6/16] (narrow) %v556_v38, 8 }
 0x188   : > { %v558_v39 = vpop.f32.mrf.mxu2 }
 0x189   : > { %v559_v40 = vadd.f32 %v818_v29, %v558_v39 }
 0x18b   : > { %594 = vxpose.xlu0.b32.cont [7/16] (narrow) %v559_v40, 8 }
 0x18d   : > { %v582_v55 = vpop.f32.mrf.mxu3 }
 0x18e   : > { %v583_v56 = vadd.f32 %v818_v29, %v582_v55 }
 0x190   : > { %v561_v41 = vpop.f32.mrf.mxu2 }
 0x191   : > { %v562_v42 = vadd.f32 %v818_v29, %v561_v41 }
 0x193   : > { %595 = vxpose.xlu0.b32.cont [8/16] (narrow) %v562_v42, 8 }
 0x195   : > { %v585_v57 = vpop.f32.mrf.mxu3 }
 0x196   : > { %v586_v58 = vadd.f32 %v818_v29, %v585_v57 }
 0x198   : > { %v564_v43 = vpop.f32.mrf.mxu2 }
 0x199   : > { %v565_v44 = vadd.f32 %v818_v29, %v564_v43 }
 0x19b   : > { %596 = vxpose.xlu0.b32.cont [9/16] (narrow) %v565_v44, 8 }
 0x1a0   : > { %v567_v45 = vpop.f32.mrf.mxu2 }
 0x1a1   : > { %v568_v46 = vadd.f32 %v818_v29, %v567_v45 }
 0x1a3   : > { %597 = vxpose.xlu0.b32.cont [10/16] (narrow) %v568_v46, 8 }
 0x1a8   : > { %v570_v47 = vpop.f32.mrf.mxu2 }
 0x1a9   : > { %v571_v48 = vadd.f32 %v818_v29, %v570_v47 }
 0x1ab   : > { %598 = vxpose.xlu0.b32.cont [11/16] (narrow) %v571_v48, 8 }
 0x1b0   : > { %v573_v49 = vpop.f32.mrf.mxu2 }
 0x1b1   : > { %v574_v50 = vadd.f32 %v818_v29, %v573_v49 }
 0x1b3   : > { %599 = vxpose.xlu0.b32.cont [12/16] (narrow) %v574_v50, 8 }
 0x1b8   : > { %v576_v51 = vpop.f32.mrf.mxu2 }
 0x1b9   : > { %v577_v52 = vadd.f32 %v818_v29, %v576_v51 }
 0x1bb   : > { %600 = vxpose.xlu0.b32.cont [13/16] (narrow) %v577_v52, 8 }
 0x1c0   : > { %v579_v53 = vpop.f32.mrf.mxu2 }
 0x1c1   : > { %v580_v54 = vadd.f32 %v818_v29, %v579_v53 }
 0x1c3   : > { %601 = vxpose.xlu0.b32.cont [14/16] (narrow) %v580_v54, 8 }
 0x1cb   : > { %602 = vxpose.xlu0.b32.cont [15/16] (narrow) %v583_v56, 8 }
 0x1d3   : > { %603 = vxpose.xlu0.b32.end [16/16] (narrow) %v586_v58, 8 }
 0x1ff   : > { %v604_v59 = vpop.trf.xlu0 }
 0x200   : > { %620 = vst [vmem:[%s246_s9] sm:$0x1] %v604_v59 }
 0x201   : > { %908 = shalt.err (!%p905_p4)
}
 0x202   : > { %771 = dma.vmem_to_hbm [thread:$0]  (%p1033_p10), %s633_s10, 16, %s635_s8, %s622_s11  }
 0x203 PF: > { %p782_p5 = scmp.ge.s32.totalorder %s947_s23, 2  ;;  %s646_s12 = sand.u32 1, %s935_s20  }
 0x204   : > { %s647_s18 = scalar_lea.sflag [#allocation5], %s646_s12 }
 0x205   : > { %p778_p7 = pnand %p782_p5, %p1037_p11 }
 0x207   : > { %p779_p8 = pneg %p778_p7 }
 0x209   : > { %930 = dma.done.wait (%p779_p8), %s647_s18, 16  }
 0x20a   : > { %932 = vsyncadd (%p779_p8), %s647_s18, 4294967280  ;;  %p20_p9 = scmp.ge.s32.totalorder %s1009_s25, 6   ;;  %s1358_s20 = smov %s939_s21 }
 0x20b   : > { %s1359_s21 = smov %s943_s22  ;;  %s1360_s22 = smov %s1021_s28 }
 0x20c   : > { %s1361_s23 = smov %s1009_s25  ;;  %22 = sbr.rel (!%p20_p9) target bundleno = 8 (0x8), region = 85 }
 0x211   :  { %652 = vsyncpa [#allocation4], 1 }
 0x212   :  { %654 = vsyncpa [#allocation4 + $0x1], 1 }
 0x213   :  { %655 = vsyncpa [#allocation5], 1 }
 0x214   :  { %657 = vsyncpa [#allocation5 + $0x1], 1 }

</bundles_post_ra>
